<compile_context>
chip_gen: v7x
topology: tpu7x:2x2x1
jax: 0.10.0
libtpu: 0.0.40
codegen_flags: <defaults>
</compile_context>

<pallas_src>
import functools
import math

import jax
import jax.numpy as jnp
from jax import lax
from jax.experimental import pallas as pl
from jax.experimental.pallas import tpu as pltpu

_NEG_INF = -1e30  # large finite negative; avoids inf-inf NaNs on the mask path


# ---------------------------------------------------------------------------
# Kernel A: fused QKV projection, head-major output layout.
# ---------------------------------------------------------------------------
def _qkv_proj_kernel(x_ref, w_ref, b_ref, q_ref, k_ref, v_ref, *,
                     num_heads, qk_dim):
    D = num_heads * qk_dim
    x = x_ref[0]                                                # (tt, Din) bf16
    qkv = (jnp.dot(x, w_ref[...], preferred_element_type=jnp.float32)
           + b_ref[...]).astype(jnp.bfloat16)                   # (tt, 3D)
    # Scatter into head-major layout once per (b, t-tile); per-head reads in
    # the attention kernel then become clean leading-axis views.
    for h in range(num_heads):
        lo = h * qk_dim
        q_ref[0, h] = qkv[:, lo:lo + qk_dim]
        k_ref[0, h] = qkv[:, D + lo:D + lo + qk_dim]
        v_ref[0, h] = qkv[:, 2 * D + lo:2 * D + lo + qk_dim]


# ---------------------------------------------------------------------------
# Kernel B: flash attention (online softmax over a KV grid axis) + out proj.
# ---------------------------------------------------------------------------
def _flash_attn_kernel(q_ref, k_ref, v_ref, wp_ref, bp_ref, out_ref,
                       m_s, l_s, acc_s, hv_s, *,
                       num_heads, qk_dim, tq, tk, causal):
    qi = pl.program_id(1)
    kv = pl.program_id(2)

    @pl.when(kv == 0)
    def _init():
        m_s[...] = jnp.full_like(m_s, _NEG_INF)
        l_s[...] = jnp.zeros_like(l_s)
        acc_s[...] = jnp.zeros_like(acc_s)

    def _compute_tile():
        if causal:
            row = qi * tq + lax.broadcasted_iota(jnp.int32, (tq, tk), 0)
            col = kv * tk + lax.broadcasted_iota(jnp.int32, (tq, tk), 1)
            banned = col > row
        # Static head loop: per-head state dies at the scratch writes, so
        # live ranges stay bounded even when unrolled.
        for h in range(num_heads):
            qh = q_ref[0, h]                                    # (tq, qk) bf16
            kh = k_ref[0, h]                                    # (tk, qk) bf16
            vh = v_ref[0, h]                                    # (tk, qk) bf16
            # q @ k^T with the transpose folded into the MXU operand.
            s = lax.dot_general(qh, kh, (((1,), (1,)), ((), ())),
                                preferred_element_type=jnp.float32)  # (tq, tk)
            if causal:
                s = jnp.where(banned, _NEG_INF, s)
            m_prev = m_s[h]                                     # (tq, 1) f32
            m_new = jnp.maximum(m_prev, jnp.max(s, axis=-1, keepdims=True))
            alpha = jnp.exp(m_prev - m_new)
            p = jnp.exp(s - m_new)                              # f32
            l_s[h] = alpha * l_s[h] + jnp.sum(p, axis=-1, keepdims=True)
            acc_s[h] = alpha * acc_s[h] + jnp.dot(
                p.astype(jnp.bfloat16), vh,
                preferred_element_type=jnp.float32)             # (tq, qk)
            m_s[h] = m_new

    if causal:
        # Skip KV tiles strictly above the diagonal (~2x FLOP saving).
        pl.when(kv * tk < (qi + 1) * tq)(_compute_tile)
    else:
        _compute_tile()

    @pl.when(kv == pl.num_programs(2) - 1)
    def _finalize():
        # Normalize each head into a (tq, D) bf16 slab, then ONE D-wide output
        # projection (full MXU contraction depth, no per-head matmuls).
        for h in range(num_heads):
            inv_l = pl.reciprocal(l_s[h], approx=True)          # EUP
            hv_s[:, h * qk_dim:(h + 1) * qk_dim] = (
                acc_s[h] * inv_l).astype(jnp.bfloat16)
        out = jnp.dot(hv_s[...], wp_ref[...],
                      preferred_element_type=jnp.float32) + bp_ref[...]
        out_ref[0] = out.astype(out_ref.dtype)


# ---------------------------------------------------------------------------
# VMEM budgeting helper ((8, 128) tile padding, x2 for double-buffered blocks).
# ---------------------------------------------------------------------------
def _padded_vmem_bytes(shape, dtype):
    shape = tuple(shape)
    lead = 1
    for d in shape[:-2]:
        lead *= d
    sub = -(-shape[-2] // 8) * 8
    lane = -(-shape[-1] // 128) * 128
    return lead * sub * lane * jnp.dtype(dtype).itemsize


def _vmem_limit_bytes(blocks, scratch=()):
    total = sum(2 * _padded_vmem_bytes(s, d) for s, d in blocks)   # 2 buffers
    total += sum(_padded_vmem_bytes(s, d) for s, d in scratch)
    # 2x headroom + 2 MiB for compiler-internal scratch; clamp to v7x VMEM.
    return int(min(64 << 20, max(16 << 20, 2 * total + (2 << 20))))


# ---------------------------------------------------------------------------
# Wrapper.
# ---------------------------------------------------------------------------
def self_attention_pallas(x, params, *, num_heads, qk_dim, context_size,
                          q_block=None, kv_block=None, t_block=None,
                          out_dtype=jnp.bfloat16):
    """Forward pass of SelfAttention (eval mode: dropout = identity)."""
    B, T, in_dim = x.shape
    D = num_heads * qk_dim
    wq, bq, wk, bk, wv, bv, wp, bp = params
    causal = context_size is not None

    # Fold 1/sqrt(qk_dim) into the query projection; fuse QKV weights/biases.
    # NOTE: if weights are static across steps, hoist this concat/cast out of
    # the hot path (it runs as separate XLA ops on every call otherwise).
    scale = 1.0 / math.sqrt(qk_dim)
    w_qkv = jnp.concatenate([wq * scale, wk, wv], axis=1).astype(jnp.bfloat16)
    b_qkv = jnp.concatenate([bq * scale, bk, bv], axis=1).astype(jnp.float32)
    wp_b = wp.astype(jnp.bfloat16)
    bp_f = bp.astype(jnp.float32)
    x_b = x.astype(jnp.bfloat16)

    # Tile sizes.
    tt = t_block or (T if T <= 256 else 256)     # projection T-tile
    tq = q_block or (T if T <= 128 else 128)     # query tile
    tk = kv_block or (T if T <= 128 else 128)    # KV tile
    assert T % tt == 0 and T % tq == 0 and T % tk == 0, \
        "T must be a multiple of the projection/query/KV tiles"
    nt, nq, nk = T // tt, T // tq, T // tk

    # ------------------ Kernel A: QKV projection ---------------------------
    qkv_kernel = functools.partial(_qkv_proj_kernel, num_heads=num_heads,
                                   qk_dim=qk_dim)
    head_shape = jax.ShapeDtypeStruct((B, num_heads, T, qk_dim), jnp.bfloat16)
    blocks_a = [
        ((1, tt, in_dim), jnp.bfloat16),
        ((in_dim, 3 * D), jnp.bfloat16),
        ((1, 3 * D), jnp.float32),
        ((1, num_heads, tt, qk_dim), jnp.bfloat16),
        ((1, num_heads, tt, qk_dim), jnp.bfloat16),
        ((1, num_heads, tt, qk_dim), jnp.bfloat16),
    ]
    proj_cost = pl.CostEstimate(
        flops=2 * B * T * in_dim * 3 * D,
        transcendentals=0,
        bytes_accessed=(B * T * in_dim * 2 + in_dim * 3 * D * 2
                        + 3 * B * num_heads * T * qk_dim * 2))
    q, k, v = pl.pallas_call(
        qkv_kernel,
        out_shape=(head_shape, head_shape, head_shape),
        grid_spec=pltpu.PrefetchScalarGridSpec(
            num_scalar_prefetch=0,
            grid=(B, nt),
            in_specs=[
                pl.BlockSpec((1, tt, in_dim), lambda b, ti: (b, ti, 0)),
                pl.BlockSpec((in_dim, 3 * D), lambda b, ti: (0, 0)),
                pl.BlockSpec((1, 3 * D), lambda b, ti: (0, 0)),
            ],
            out_specs=[
                pl.BlockSpec((1, num_heads, tt, qk_dim),
                             lambda b, ti: (b, 0, ti, 0)),
                pl.BlockSpec((1, num_heads, tt, qk_dim),
                             lambda b, ti: (b, 0, ti, 0)),
                pl.BlockSpec((1, num_heads, tt, qk_dim),
                             lambda b, ti: (b, 0, ti, 0)),
            ],
        ),
        compiler_params=pltpu.CompilerParams(
            dimension_semantics=("parallel", "parallel"),
            vmem_limit_bytes=_vmem_limit_bytes(blocks_a)),
        cost_estimate=proj_cost,
    )(x_b, w_qkv, b_qkv)

    # ------------------ Kernel B: flash attention + projection --------------
    attn_kernel = functools.partial(_flash_attn_kernel, num_heads=num_heads,
                                    qk_dim=qk_dim, tq=tq, tk=tk, causal=causal)
    attn_flops = 4 * B * T * T * D                      # QK^T + PV
    if causal:
        attn_flops //= 2
    attn_cost = pl.CostEstimate(
        flops=attn_flops + 2 * B * T * D * in_dim,
        transcendentals=B * num_heads * T * T,
        bytes_accessed=(3 * B * num_heads * T * qk_dim * 2
                        + D * in_dim * 2
                        + B * T * in_dim * jnp.dtype(out_dtype).itemsize))
    blocks_b = [
        ((1, num_heads, tq, qk_dim), jnp.bfloat16),     # q
        ((1, num_heads, tk, qk_dim), jnp.bfloat16),     # k
        ((1, num_heads, tk, qk_dim), jnp.bfloat16),     # v
        ((D, in_dim), jnp.bfloat16),                    # wp
        ((1, in_dim), jnp.float32),                     # bp
        ((1, tq, in_dim), out_dtype),                   # out
    ]
    scratch_b = [
        ((num_heads, tq, 1), jnp.float32),              # running max m
        ((num_heads, tq, 1), jnp.float32),              # running sum l
        ((num_heads, tq, qk_dim), jnp.float32),         # running acc
        ((tq, D), jnp.bfloat16),                        # concatenated hv slab
    ]

    out = pl.pallas_call(
        attn_kernel,
        out_shape=jax.ShapeDtypeStruct((B, T, in_dim), out_dtype),
        grid_spec=pltpu.PrefetchScalarGridSpec(
            num_scalar_prefetch=0,
            grid=(B, nq, nk),
            in_specs=[
                pl.BlockSpec((1, num_heads, tq, qk_dim),
                             lambda b, qi, kv: (b, 0, qi, 0)),
                pl.BlockSpec((1, num_heads, tk, qk_dim),
                             lambda b, qi, kv: (b, 0, kv, 0)),
                pl.BlockSpec((1, num_heads, tk, qk_dim),
                             lambda b, qi, kv: (b, 0, kv, 0)),
                pl.BlockSpec((D, in_dim), lambda b, qi, kv: (0, 0)),
                pl.BlockSpec((1, in_dim), lambda b, qi, kv: (0, 0)),
            ],
            out_specs=pl.BlockSpec((1, tq, in_dim),
                                   lambda b, qi, kv: (b, qi, 0)),
            scratch_shapes=[pltpu.VMEM(s, d) for s, d in scratch_b],
        ),
        compiler_params=pltpu.CompilerParams(
            # b and q-tile axes are parallel (keeps both v7x cores busy even
            # at B=1); only the KV axis carries the online-softmax state.
            dimension_semantics=("parallel", "parallel", "arbitrary"),
            vmem_limit_bytes=_vmem_limit_bytes(blocks_b, scratch_b)),
        cost_estimate=attn_cost,
    )(q, k, v, wp_b, bp_f)
    return out


def reference_jax(x, params, *, num_heads, qk_dim, context_size):
    """Plain-JAX (f32) replica of the PyTorch forward (dropout = identity)."""
    B, T, _ = x.shape
    wq, bq, wk, bk, wv, bv, wp, bp = params
    q = x @ wq + bq
    k = x @ wk + bk
    v = x @ wv + bv
    q = q.reshape(B, T, num_heads, qk_dim).transpose(0, 2, 1, 3)
    k = k.reshape(B, T, num_heads, qk_dim).transpose(0, 2, 1, 3)
    v = v.reshape(B, T, num_heads, qk_dim).transpose(0, 2, 1, 3)
    att = jnp.einsum("bhqd,bhkd->bhqk", q, k) * (qk_dim ** -0.5)
    if context_size is not None:
        row = jax.lax.broadcasted_iota(jnp.int32, (T, T), 0)
        col = jax.lax.broadcasted_iota(jnp.int32, (T, T), 1)
        att = jnp.where(col > row, -jnp.inf, att)
    att = jax.nn.softmax(att, axis=-1)
    o = jnp.einsum("bhqk,bhkd->bhqd", att, v)
    o = o.transpose(0, 2, 1, 3).reshape(B, T, num_heads * qk_dim)
    return o @ wp + bp


if __name__ == "__main__":
    # Small, forward-consistent shapes.
    B, T = 2, 8
    in_dim, qk_dim, num_heads = 32, 16, 2
    context_size = T
    D = qk_dim * num_heads

    key = jax.random.PRNGKey(0)
    ks = jax.random.split(key, 9)
    scale_in = 1.0 / math.sqrt(in_dim)
    scale_d = 1.0 / math.sqrt(D)

    x = jax.random.normal(ks[0], (B, T, in_dim), jnp.float32)
    # Parameters stored (in, out); biases (1, out) (nn.Linear weights pre-transposed).
    wq = jax.random.uniform(ks[1], (in_dim, D), jnp.float32, -scale_in, scale_in)
    bq = jax.random.uniform(ks[2], (1, D), jnp.float32, -scale_in, scale_in)
    wk = jax.random.uniform(ks[3], (in_dim, D), jnp.float32, -scale_in, scale_in)
    bk = jax.random.uniform(ks[4], (1, D), jnp.float32, -scale_in, scale_in)
    wv = jax.random.uniform(ks[5], (in_dim, D), jnp.float32, -scale_in, scale_in)
    bv = jax.random.uniform(ks[6], (1, D), jnp.float32, -scale_in, scale_in)
    wp = jax.random.uniform(ks[7], (D, in_dim), jnp.float32, -scale_d, scale_d)
    bp = jax.random.uniform(ks[8], (1, in_dim), jnp.float32, -scale_d, scale_d)
    params = (wq, bq, wk, bk, wv, bv, wp, bp)

    out = self_attention_pallas(x, params, num_heads=num_heads,
                                qk_dim=qk_dim, context_size=context_size)
    out = jax.block_until_ready(out)

    ref = reference_jax(x, params, num_heads=num_heads,
                        qk_dim=qk_dim, context_size=context_size)
    assert out.shape == (B, T, in_dim)
    out_f32 = out.astype(jnp.float32)
    err = float(jnp.max(jnp.abs(out_f32 - ref)))
    # bf16 MXU inputs, bf16 output and approx reciprocal -> loose tolerance.
    assert jnp.allclose(out_f32, ref, atol=4e-2, rtol=4e-2), \
        f"mismatch vs reference, max abs err={err}"

    print("KERNEL_OK")
</pallas_src>

<mosaic_0001>
module attributes {stable_mosaic.version = 11 : i64} {
  func.func @_qkv_proj_kernel(%arg0: i32, %arg1: i32, %arg2: memref<1x8x32xbf16, #tpu.memory_space<vmem>>, %arg3: memref<32x96xbf16, #tpu.memory_space<vmem>>, %arg4: memref<1x96xf32, #tpu.memory_space<vmem>>, %arg5: memref<1x2x8x16xbf16, #tpu.memory_space<vmem>>, %arg6: memref<1x2x8x16xbf16, #tpu.memory_space<vmem>>, %arg7: memref<1x2x8x16xbf16, #tpu.memory_space<vmem>>) attributes {dimension_semantics = [#tpu.dimension_semantics<parallel>, #tpu.dimension_semantics<parallel>], iteration_bounds = array<i64: 2, 1>, scalar_prefetch = 0 : i64, scratch_operands = 0 : i64, tpu.core_type = #tpu.core_type<tc>, window_params = [{transform_indices = @transform_0, window_bounds = array<i64: 1, 8, 32>}, {pipeline_mode = #tpu.pipeline_mode<synchronous>, transform_indices = @transform_1, window_bounds = array<i64: 32, 96>}, {pipeline_mode = #tpu.pipeline_mode<synchronous>, transform_indices = @transform_2, window_bounds = array<i64: 1, 96>}, {transform_indices = @transform_3, window_bounds = array<i64: 1, 2, 8, 16>}, {transform_indices = @transform_4, window_bounds = array<i64: 1, 2, 8, 16>}, {transform_indices = @transform_5, window_bounds = array<i64: 1, 2, 8, 16>}]} {
    %c0 = arith.constant 0 : index
    %c0_0 = arith.constant 0 : index
    %c0_1 = arith.constant 0 : index
    %0 = vector.load %arg2[%c0, %c0_0, %c0_1] : memref<1x8x32xbf16, #tpu.memory_space<vmem>>, vector<1x8x32xbf16>
    %1 = vector.shape_cast %0 : vector<1x8x32xbf16> to vector<8x32xbf16>
    %c0_2 = arith.constant 0 : index
    %c0_3 = arith.constant 0 : index
    %2 = vector.load %arg3[%c0_2, %c0_3] : memref<32x96xbf16, #tpu.memory_space<vmem>>, vector<32x96xbf16>
    %cst = arith.constant dense<0.000000e+00> : vector<8x96xf32>
    %3 = tpu.matmul %1, %2, %cst {dimension_numbers = #tpu.dot_dimension_numbers<[1], [0], [0], [1], [0, 0, 1, 1], [], []>} : vector<8x32xbf16>, vector<32x96xbf16>, vector<8x96xf32> -> vector<8x96xf32>
    %c0_4 = arith.constant 0 : index
    %c0_5 = arith.constant 0 : index
    %4 = vector.load %arg4[%c0_4, %c0_5] : memref<1x96xf32, #tpu.memory_space<vmem>>, vector<1x96xf32>
    %5 = vector.broadcast %4 : vector<1x96xf32> to vector<8x96xf32>
    %6 = arith.addf %3, %5 : vector<8x96xf32>
    %7 = arith.truncf %6 : vector<8x96xf32> to vector<8x96xbf16>
    %8 = vector.extract_strided_slice %7 {offsets = [0, 0], sizes = [8, 16], strides = [1, 1]} : vector<8x96xbf16> to vector<8x16xbf16>
    %c0_6 = arith.constant 0 : index
    %c0_7 = arith.constant 0 : index
    %c0_8 = arith.constant 0 : index
    %c0_9 = arith.constant 0 : index
    %9 = vector.load %arg5[%c0_6, %c0_7, %c0_8, %c0_9] : memref<1x2x8x16xbf16, #tpu.memory_space<vmem>>, vector<1x1x8x16xbf16>
    %10 = vector.shape_cast %9 : vector<1x1x8x16xbf16> to vector<8x16xbf16>
    %11 = vector.shape_cast %8 : vector<8x16xbf16> to vector<1x1x8x16xbf16>
    tpu.vector_store %arg5[%c0_6, %c0_7, %c0_8, %c0_9], %11 {strides = array<i32>} : memref<1x2x8x16xbf16, #tpu.memory_space<vmem>>, vector<1x1x8x16xbf16>,
    %12 = vector.extract_strided_slice %7 {offsets = [0, 32], sizes = [8, 16], strides = [1, 1]} : vector<8x96xbf16> to vector<8x16xbf16>
    %c0_10 = arith.constant 0 : index
    %c0_11 = arith.constant 0 : index
    %c0_12 = arith.constant 0 : index
    %c0_13 = arith.constant 0 : index
    %13 = vector.load %arg6[%c0_10, %c0_11, %c0_12, %c0_13] : memref<1x2x8x16xbf16, #tpu.memory_space<vmem>>, vector<1x1x8x16xbf16>
    %14 = vector.shape_cast %13 : vector<1x1x8x16xbf16> to vector<8x16xbf16>
    %15 = vector.shape_cast %12 : vector<8x16xbf16> to vector<1x1x8x16xbf16>
    tpu.vector_store %arg6[%c0_10, %c0_11, %c0_12, %c0_13], %15 {strides = array<i32>} : memref<1x2x8x16xbf16, #tpu.memory_space<vmem>>, vector<1x1x8x16xbf16>,
    %16 = vector.extract_strided_slice %7 {offsets = [0, 64], sizes = [8, 16], strides = [1, 1]} : vector<8x96xbf16> to vector<8x16xbf16>
    %c0_14 = arith.constant 0 : index
    %c0_15 = arith.constant 0 : index
    %c0_16 = arith.constant 0 : index
    %c0_17 = arith.constant 0 : index
    %17 = vector.load %arg7[%c0_14, %c0_15, %c0_16, %c0_17] : memref<1x2x8x16xbf16, #tpu.memory_space<vmem>>, vector<1x1x8x16xbf16>
    %18 = vector.shape_cast %17 : vector<1x1x8x16xbf16> to vector<8x16xbf16>
    %19 = vector.shape_cast %16 : vector<8x16xbf16> to vector<1x1x8x16xbf16>
    tpu.vector_store %arg7[%c0_14, %c0_15, %c0_16, %c0_17], %19 {strides = array<i32>} : memref<1x2x8x16xbf16, #tpu.memory_space<vmem>>, vector<1x1x8x16xbf16>,
    %20 = vector.extract_strided_slice %7 {offsets = [0, 16], sizes = [8, 16], strides = [1, 1]} : vector<8x96xbf16> to vector<8x16xbf16>
    %c0_18 = arith.constant 0 : index
    %c1 = arith.constant 1 : index
    %c0_19 = arith.constant 0 : index
    %c0_20 = arith.constant 0 : index
    %21 = vector.load %arg5[%c0_18, %c1, %c0_19, %c0_20] : memref<1x2x8x16xbf16, #tpu.memory_space<vmem>>, vector<1x1x8x16xbf16>
    %22 = vector.shape_cast %21 : vector<1x1x8x16xbf16> to vector<8x16xbf16>
    %23 = vector.shape_cast %20 : vector<8x16xbf16> to vector<1x1x8x16xbf16>
    tpu.vector_store %arg5[%c0_18, %c1, %c0_19, %c0_20], %23 {strides = array<i32>} : memref<1x2x8x16xbf16, #tpu.memory_space<vmem>>, vector<1x1x8x16xbf16>,
    %24 = vector.extract_strided_slice %7 {offsets = [0, 48], sizes = [8, 16], strides = [1, 1]} : vector<8x96xbf16> to vector<8x16xbf16>
    %c0_21 = arith.constant 0 : index
    %c1_22 = arith.constant 1 : index
    %c0_23 = arith.constant 0 : index
    %c0_24 = arith.constant 0 : index
    %25 = vector.load %arg6[%c0_21, %c1_22, %c0_23, %c0_24] : memref<1x2x8x16xbf16, #tpu.memory_space<vmem>>, vector<1x1x8x16xbf16>
    %26 = vector.shape_cast %25 : vector<1x1x8x16xbf16> to vector<8x16xbf16>
    %27 = vector.shape_cast %24 : vector<8x16xbf16> to vector<1x1x8x16xbf16>
    tpu.vector_store %arg6[%c0_21, %c1_22, %c0_23, %c0_24], %27 {strides = array<i32>} : memref<1x2x8x16xbf16, #tpu.memory_space<vmem>>, vector<1x1x8x16xbf16>,
    %28 = vector.extract_strided_slice %7 {offsets = [0, 80], sizes = [8, 16], strides = [1, 1]} : vector<8x96xbf16> to vector<8x16xbf16>
    %c0_25 = arith.constant 0 : index
    %c1_26 = arith.constant 1 : index
    %c0_27 = arith.constant 0 : index
    %c0_28 = arith.constant 0 : index
    %29 = vector.load %arg7[%c0_25, %c1_26, %c0_27, %c0_28] : memref<1x2x8x16xbf16, #tpu.memory_space<vmem>>, vector<1x1x8x16xbf16>
    %30 = vector.shape_cast %29 : vector<1x1x8x16xbf16> to vector<8x16xbf16>
    %31 = vector.shape_cast %28 : vector<8x16xbf16> to vector<1x1x8x16xbf16>
    tpu.vector_store %arg7[%c0_25, %c1_26, %c0_27, %c0_28], %31 {strides = array<i32>} : memref<1x2x8x16xbf16, #tpu.memory_space<vmem>>, vector<1x1x8x16xbf16>,
    return
  }
  func.func @transform_0(%arg0: i32, %arg1: i32) -> (i32, i32, i32) {
    %c0_i32 = arith.constant 0 : i32
    %c0_i32_0 = arith.constant 0 : i32
    return %arg0, %arg1, %c0_i32 : i32, i32, i32
  }
  func.func @transform_1(%arg0: i32, %arg1: i32) -> (i32, i32) {
    %c0_i32 = arith.constant 0 : i32
    %c0_i32_0 = arith.constant 0 : i32
    %c0_i32_1 = arith.constant 0 : i32
    return %c0_i32, %c0_i32_0 : i32, i32
  }
  func.func @transform_2(%arg0: i32, %arg1: i32) -> (i32, i32) {
    %c0_i32 = arith.constant 0 : i32
    %c0_i32_0 = arith.constant 0 : i32
    %c0_i32_1 = arith.constant 0 : i32
    return %c0_i32, %c0_i32_0 : i32, i32
  }
  func.func @transform_3(%arg0: i32, %arg1: i32) -> (i32, i32, i32, i32) {
    %c0_i32 = arith.constant 0 : i32
    %c0_i32_0 = arith.constant 0 : i32
    %c0_i32_1 = arith.constant 0 : i32
    return %arg0, %c0_i32, %arg1, %c0_i32_0 : i32, i32, i32, i32
  }
  func.func @transform_4(%arg0: i32, %arg1: i32) -> (i32, i32, i32, i32) {
    %c0_i32 = arith.constant 0 : i32
    %c0_i32_0 = arith.constant 0 : i32
    %c0_i32_1 = arith.constant 0 : i32
    return %arg0, %c0_i32, %arg1, %c0_i32_0 : i32, i32, i32, i32
  }
  func.func @transform_5(%arg0: i32, %arg1: i32) -> (i32, i32, i32, i32) {
    %c0_i32 = arith.constant 0 : i32
    %c0_i32_0 = arith.constant 0 : i32
    %c0_i32_1 = arith.constant 0 : i32
    return %arg0, %c0_i32, %arg1, %c0_i32_0 : i32, i32, i32, i32
  }
}

</mosaic_0001>

<bundles_post_ra>
// kernel: tpu_custom_call.1
= control target key start
LH: loop header
LB: loop body
LE: loop exit
PB: predicated region body
PF: predicated region fallthrough
CT: control target
= control target key end

     0   :  { %s1305_s0 = inlined_call_operand.hbm [shape: bf16[2,8,32], index: 0, kind: input, shape index: {}]   ;;  %s1306_s1 = inlined_call_operand.hbm [shape: bf16[32,96], index: 1, kind: input, shape index: {}]   ;;  %s1307_s2 = inlined_call_operand.vmem [shape: f32[1,96], index: 2, kind: input, shape index: {}]   ;;  %s1308_s3 = inlined_call_operand.hbm [shape: bf16[2,2,8,16], index: 3, kind: output, shape index: {0}]   ;;  %s1309_s4 = inlined_call_operand.hbm [shape: bf16[2,2,8,16], index: 4, kind: output, shape index: {1}]   ;;  %s1310_s5 = inlined_call_operand.hbm [shape: bf16[2,2,8,16], index: 5, kind: output, shape index: {2}]  }
   0x1   :  { %1317 = sst [smem:[#allocation15_spill]] %s1305_s0 }
   0x2   :  { %1318 = sst [smem:[#allocation16_spill]] %s1306_s1 }
   0x3   :  { %1319 = sst [smem:[#allocation17_spill]] %s1307_s2 }
   0x4   :  { %11 = vsyncpa [#allocation3], 0 }
   0x5   :  { %13 = vsyncpa [#allocation3 + $0x1], 0 }
   0x6   :  { %14 = vsyncpa [#allocation6], 0 }
   0x7   :  { %15 = vsyncpa [#allocation4], 0 }
   0x8   :  { %17 = vsyncpa [#allocation4 + $0x1], 0 }
   0x9   :  { %18 = vsyncpa [#allocation9], 0 }
   0xa   :  { %20 = vsyncpa [#allocation9 + $0x1], 0  ;;  %s1003_s18 = smov 0   ;;  %s1005_s19 = smov 0  }
   0xb   :  { %s1007_s20 = smov 0   ;;  %s1009_s21 = smov 0  }
   0xc   :  { %s1011_s22 = smov 0   ;;  %s1013_s23 = smov 0  }
   0xd LB: > { %s1034_s24 = sadd.s32 4294967295, %s956_s23   ;;  %s1314_s25 = sadd.s32 4294967294, %s956_s23   ;;  %s956_s23 = sphi %s1013_s23, %s26_s23   ;;  %s952_s22 = sphi %s1011_s22, %s1343_s22   ;;  %s948_s21 = sphi %s1009_s21, %s1342_s21   ;;  %s944_s20 = sphi %s1007_s20, %s1341_s20   ;;  %s940_s19 = sphi %s1005_s19, %s1340_s19   ;;  %s936_s18 = sphi %s1003_s18, %s1339_s18  }
   0xe   : > { %p60_p0 = scmp.ne.s32.totalorder %s940_s19, %s936_s18  ;;  %p1311_p1 = scmp.eq.s32.totalorder %s1034_s24, 0 }
   0xf   : > { %p134_p3 = scmp.eq.s32.totalorder %s1314_s25, 1  ;;  %p612_p5 = scmp.ge.s32.totalorder %s956_s23, 1 }
  0x10   : > { %p1045_p4 = por %p1311_p1, %p60_p0  ;;  %p197_p7 = scmp.lt.s32.totalorder %s956_s23, 3 }
  0x11   : > { %p1050_p6 = por %p134_p3, %p60_p0  ;;  %s958_s29 = smov [#allocation5]  }
  0x12   : > { %s1320_s26 = scalar_select %p1045_p4, 1, 0 }
  0x13   : > { %s1321_s27 = scalar_select %p1050_p6, 1, 0 }
  0x14   : > { %p1055_p8 = pnand %p612_p5, %p197_p7  ;;  %s209_s30 = sshll.u32 %s958_s29, 4  ;;  %s210_s30 = int_to_ptr.vmem [resolvable:$true] %s209_s30 }
  0x15   : > { %s38_s7 = sadd.s32 1, %s952_s22  ;;  %s1324_s1 = sld [smem:[#allocation16_spill]] }
  0x16   : > { %s1322_s28 = scalar_select %p1055_p8, 1, 0 }
  0x17   : > { %p669_p9 = pneg %p1055_p8 }
  0x19   : > { %p1064_p11 = pnand %p669_p9, %p1311_p1 }
  0x1b   : > { %s752_s10 = scalar_lea.hbm %s1324_s1, 256  ;;  %p754_p13 = pneg %p1064_p11 }
  0x1c   : > { %p753_p12 = scmp.ne.s32.totalorder %s1324_s1, %s752_s10  ;;  %p759_p5 = scmp.lt.u32.totalorder %s752_s10, %s1324_s1 }
  0x1e   : > { %p755_p0 = pnand %p754_p13, %p753_p12 }
  0x20   : > { %p756_p3 = pneg %p755_p0 }
  0x22   : > { %p761_p7 = pnand %p759_p5, %p756_p3 }
  0x24   : > { %764 = shalt.err (!%p761_p7)
}
  0x25   : > { %s765_s15 = scalar_lea.vmem %s210_s30, 256  ;;  %p773_p2 = scmp.lt.s32.totalorder %s210_s30, %s210_s30 }
  0x26   : > { %p766_p9 = scmp.ne.s32.totalorder %s210_s30, %s765_s15  ;;  %p774_p6 = scmp.lt.s32.totalorder %s765_s15, %s765_s15 }
  0x28   : > { %p768_p10 = pnand %p766_p9, %p754_p13  ;;  %p775_p4 = por %p774_p6, %p773_p2 }
  0x2a   : > { %p769_p1 = pneg %p768_p10 }
  0x2c   : > { %p776_p8 = pnand %p775_p4, %p769_p1 }
  0x2e   : > { %779 = shalt.err (!%p776_p8)
}
  0x2f   : > { %s959_s16 = smov 64   ;;  %s960_s17 = smov 4  }
  0x30   : > { %672 = dma.hbm_to_vmem [thread:$0]  (!%p1064_p11), %s1324_s1, 256, %s210_s30, [#allocation6], %s959_s16, %s959_s16, %s960_s17  }
  0x31   : > { %p40_p1 = scmp.ge.s32.totalorder %s38_s7, 2  ;;  %s47_s9 = sadd.s32 1, %s944_s20 }
  0x32   : > { %p54_p2 = scmp.ne.s32.totalorder %s944_s20, %s940_s19  ;;  %p55_p4 = scmp.eq.s32.totalorder %s956_s23, 0 }
  0x33   : > { %s1345_s7 = smov (%p40_p1, %s38_s7), 0  ;;  %p1326_p8 = scmp.eq.s32.totalorder %s1034_s24, 1 }
  0x34   : > { %p1091_p6 = por %p55_p4, %p54_p2  ;;  %s42_s6 = ssub.s32 %s952_s22, %s1345_s7 }
  0x35   : > { %p1097_p10 = por %p1326_p8, %p54_p2  ;;  %p688_p12 = scmp.lt.s32.totalorder %s956_s23, 2 }
  0x36   : > { %p45_p11 = scmp.eq.s32.totalorder %s42_s6, 0  ;;  %s226_s30 = sand.u32 1, %s944_s20  }
  0x37   : > { %s615_s12 = sshll.u32 %s226_s30, 2  ;;  %s616_s14 = sshll.u32 %s952_s22, 6 }
  0x38   : > { %s1106_s13 = scalar_select %p45_p11, %s944_s20, %s47_s9  }
  0x39   : > { %s1328_s0 = sld [smem:[#allocation15_spill]]  ;;  %s230_s29 = scalar_lea.vmem [#allocation2], %s615_s12 }
  0x3a   : > { %s238_s8 = sshll.u32 %s230_s29, 4  ;;  %p1118_p13 = pnand %p688_p12, %p1091_p6  ;;  %s1114_s8 = int_to_ptr.vmem [resolvable:$true] %s238_s8 }
  0x3b   : > { %s227_s9 = scalar_lea.sflag [#allocation3], %s226_s30 }
  0x3c   : > { %p782_p3 = pneg %p1118_p13 }
  0x3f   : > { %s1112_s17 = scalar_lea.hbm %s1328_s0, %s616_s14  ;;  %s785_s15 = scalar_lea.hbm %s1328_s0, 128 }
  0x40   : > { %s780_s25 = scalar_lea.hbm %s1112_s17, 64  ;;  %p786_p9 = scmp.lt.u32.totalorder %s1112_s17, %s1328_s0 }
  0x41   : > { %p781_p0 = scmp.ne.s32.totalorder %s1112_s17, %s780_s25  ;;  %p787_p1 = scmp.lt.u32.totalorder %s785_s15, %s780_s25 }
  0x42   : > { %p789_p4 = scmp.lt.u32.totalorder %s780_s25, %s1112_s17 }
  0x43   : > { %p783_p5 = pnand %p782_p3, %p781_p0  ;;  %p788_p2 = por %p787_p1, %p786_p9 }
  0x45   : > { %p784_p7 = pneg %p783_p5  ;;  %p790_p6 = por %p789_p4, %p788_p2 }
  0x47   : > { %p791_p8 = pnand %p790_p6, %p784_p7 }
  0x49   : > { %794 = shalt.err (!%p791_p8)
}
  0x4a   : > { %s795_s30 = scalar_lea.vmem %s1114_s8, 64  ;;  %s961_s29 = smov [#allocation2]  }
  0x4b   : > { %p796_p12 = scmp.ne.s32.totalorder %s1114_s8, %s795_s30  ;;  %s800_s12 = sshll.u32 %s961_s29, 4  ;;  %s801_s12 = int_to_ptr.vmem [resolvable:$false] %s800_s12 }
  0x4c   : > { %s802_s14 = scalar_lea.vmem %s801_s12, 128  ;;  %p803_p5 = scmp.lt.s32.totalorder %s1114_s8, %s801_s12 }
  0x4d   : > { %p798_p11 = pnand %p796_p12, %p782_p3  ;;  %p804_p9 = scmp.lt.s32.totalorder %s802_s14, %s795_s30 }
  0x4f   : > { %p799_p0 = pneg %p798_p11  ;;  %p805_p1 = por %p804_p9, %p803_p5 }
  0x51   : > { %p806_p2 = pnand %p805_p1, %p799_p0 }
  0x53   : > { %809 = shalt.err (!%p806_p2)
}
  0x54   : > { %676 = dma.hbm_to_vmem [thread:$0]  (!%p1118_p13), %s1112_s17, 64, %s1114_s8, %s227_s9  }
  0x55   : > { %p1330_p7 = scmp.ne.s32.totalorder %s1322_s28, 0 }
  0x56   : > { %s1150_s25 = sand.u32 (!%p1330_p7), 1, %s940_s19   ;;  %p1331_p3 = scmp.ne.s32.totalorder (!%p1330_p7), %s1320_s26, 0 }
  0x57   : > { %247 = sbr.rel (%p1330_p7) target bundleno = 502 (0x1f6), region = 32  ;;  %s618_s15 = sshll.u32 (!%p1330_p7), %s1150_s25, 2 }
  0x58   : > { %s250_s10 = scalar_lea.sflag (!%p1330_p7), [#allocation3], %s1150_s25  ;;  %s253_s16 = scalar_lea.vmem (!%p1330_p7), [#allocation2], %s618_s15 }
  0x5e   : > { %919 = dma.done.wait (%p1331_p3), %s250_s10, 64  }
  0x5f   : > { %921 = vsyncadd (%p1331_p3), %s250_s10, 4294967232  ;;  %p1332_p4 = scmp.eq.s32.totalorder %s1034_s24, 0 }
  0x61   : > { %923 = dma.done.wait (%p1332_p4), [#allocation6], 256   ;;  %p1333_p13 = pmov %p1332_p4 }
  0x62   : > { %v962_v0 = vmov 0.0   ;;  %vm963_vm0 = vmmov 0   ;;  %v750_v1 = vld [vmem:[#allocation5] sm:$0xff]   ;;  %v751_v2 = vld [vmem:[#allocation5 + $0x8] sm:$0xff]   ;;  %v295_v3 = vld [vmem:[%s253_s16] sm:$0xf] }
  0x63   : > { %925 = vsyncadd (%p1333_p13), [#allocation6], 4294967040  ;;  %649 = vmatprep.subr.bf16.mxu0 %v962_v0  ;;  %653 = vmatprep.mubr.msk.bf16.mxu0 %vm963_vm0, %v962_v0  ;;  %vm319_vm1 = vcmask 261120   ;;  %s1334_s2 = sld [smem:[#allocation17_spill]]  ;;  %s620_s17 = sshll.u32 %s1150_s25, 3  ;;  %vm364_vm2 = vcmask 125952  }
  0x64   : > { %650 = vmatpush3.bf16.msra.mxu0 %v750_v1  ;;  %s1315_s8 = smov 64   ;;  %s965_s6 = smov 96  }
  0x65   : > { %651 = vmatprep.subr.bf16.mxu0 %v962_v0  ;;  %s279_s9 = scalar_lea.vmem [#allocation7], %s620_s17  ;;  %s966_s30 = smov 112  }
  0x66   : > { %s967_s29 = smov 80   ;;  %s968_s12 = smov 48  }
  0x67   : > { %s286_s14 = scalar_lea.vmem [#allocation8], %s620_s17  ;;  %s417_s10 = sshll.u32 %s279_s9, 4  ;;  %s1178_s10 = int_to_ptr.vmem [resolvable:$true] %s417_s10 }
  0x68   : > { %652 = vmatpush3.bf16.msra.mxu0 %v751_v2  ;;  %s434_s15 = sshll.u32 %s286_s14, 4  ;;  %s397_s16 = sand.u32 1, %s1034_s24   ;;  %s1175_s15 = int_to_ptr.vmem [resolvable:$true] %s434_s15 }
  0x69   : > { %v623_v4 = vld [vmem:[%s1334_s2] ss:$0 sm:$0xff]  ;;  %s643_s26 = sshll.u32 %s948_s21, 7  ;;  %s1170_s28 = scalar_lea.vmem [#allocation10], %s620_s17 }
  0x6a   : > { %s1183_s21 = scalar_lea.hbm %s1309_s4, %s643_s26  ;;  %s1197_s24 = scalar_lea.hbm %s1310_s5, %s643_s26 }
  0x6b   : > { %654 = vmatmul.mubr.msk.bf16.vlgmr.msra.gmra.mrb[0].mxu0 %vm319_vm1, %v295_v3  ;;  %s810_s1 = scalar_lea.vmem %s1175_s15, 128  ;;  %s969_s17 = smov [#allocation8]  }
  0x6c   : > { %p811_p6 = scmp.ne.s32.totalorder %s1175_s15, %s810_s1 }
  0x6e   : > { %p812_p8 = pnand %p811_p6, %p1097_p10 }
  0x70   : > { %p813_p12 = pneg %p812_p8 }
 0x13e   : > { %v357_v5 = vpop.f32.mrb[0].mxu0 }
 0x13f   : > { %v358_v6 = vadd.f32 %v623_v4, %v357_v5  ;;  %v655_v7 = vpop.f32.mrb[1].mxu0 }
 0x140   : > { %v360_v8 = vpop.f32.mrb[2].mxu0 }
 0x141   : > { %v363_v9 = vpack.c.bf16 %v358_v6, %v358_v6  ;;  %v656_v10 = vpop.f32.mrb[3].mxu0 }
 0x143   : > { %373 = vrot.lane.b32.xlu1 %v363_v9, %s1315_s8  ;;  %369 = vrot.lane.b32.xlu0 %v363_v9, %s965_s6  ;;  %365 = vst.msk [vmem:[%s279_s9] sm:$0xf] %vm364_vm2, %v363_v9  ;;  %s451_s6 = sshll.u32 %s1170_s28, 4  ;;  %s1190_s6 = int_to_ptr.vmem [resolvable:$true] %s451_s6 }
 0x147   : > { %377 = vrot.lane.b32.xlu1 %v363_v9, %s966_s30  ;;  %382 = vrot.lane.b32.xlu0 %v363_v9, %s967_s29  ;;  %s1199_s30 = scalar_lea.sflag [#allocation9], %s397_s16  ;;  %s814_s29 = sshll.u32 %s969_s17, 4  ;;  %s815_s29 = int_to_ptr.vmem [resolvable:$false] %s814_s29 }
 0x148   : > { %s816_s2 = scalar_lea.vmem %s815_s29, 256  ;;  %p817_p11 = scmp.lt.s32.totalorder %s1175_s15, %s815_s29 }
 0x149   : > { %p818_p0 = scmp.lt.s32.totalorder %s816_s2, %s810_s1 }
 0x14b   : > { %387 = vrot.lane.b32.xlu0 %v363_v9, %s968_s12  ;;  %s1188_s12 = scalar_lea.hbm %s1308_s3, %s643_s26  ;;  %p819_p5 = por %p818_p0, %p817_p11 }
 0x14d   : > { %p820_p9 = pnand %p819_p5, %p813_p12 }
 0x1b5   : > { %v374_v11 = vpop.permute.xlu1 %373  ;;  %v370_v12 = vpop.permute.xlu0 %369 }
 0x1b6   : > { %376 = vst.msk [vmem:[%s1170_s28] sm:$0xf] %vm364_vm2, %v374_v11  ;;  %372 = vst.msk [vmem:[%s286_s14] sm:$0xf] %vm364_vm2, %v370_v12 }
 0x1b9   : > { %v378_v13 = vpop.permute.xlu1 %377  ;;  %v383_v14 = vpop.permute.xlu0 %382 }
 0x1ba   : > { %628 = vst.msk [vmem:[%s279_s9 + $0x4] sm:$0xf] %vm364_vm2, %v378_v13  ;;  %629 = vst.msk [vmem:[%s286_s14 + $0x4] sm:$0xf] %vm364_vm2, %v383_v14 }
 0x1bb   : > { %823 = shalt.err (!%p820_p9)
}
 0x1bc   : > { %s824_s0 = scalar_lea.hbm %s1183_s21, 128  ;;  %s828_s14 = scalar_lea.hbm %s1309_s4, 256 }
 0x1bd   : > { %p825_p1 = scmp.ne.s32.totalorder %s1183_s21, %s824_s0  ;;  %p829_p3 = scmp.lt.u32.totalorder %s1183_s21, %s1309_s4 }
 0x1be   : > { %p830_p4 = scmp.lt.u32.totalorder %s828_s14, %s824_s0  ;;  %p832_p6 = scmp.lt.u32.totalorder %s824_s0, %s1183_s21 }
 0x1bf   : > { %p826_p2 = pnand %p825_p1, %p1097_p10 }
 0x1c0   : > { %p831_p13 = por %p830_p4, %p829_p3 }
 0x1c1   : > { %p827_p7 = pneg %p826_p2 }
 0x1c2   : > { %p833_p8 = por %p832_p6, %p831_p13 }
 0x1c4   : > { %p834_p12 = pnand %p833_p8, %p827_p7 }
 0x1c6   : > { %837 = shalt.err (!%p834_p12)
}
 0x1c7   : > { %s970_s1 = smov 4   ;;  %s1335_s2 = smov 64  }
 0x1c8   : > { %664 = dma.vmem_to_hbm [thread:$0]  (%p1097_p10), %s1175_s15, 128, %s1183_s21, %s1199_s30, %s1335_s2, %s1335_s2, %s970_s1  }
 0x1c9   : > { %s393_s17 = scalar_lea.sflag [#allocation4], %s1150_s25  ;;  %s838_s29 = scalar_lea.vmem %s1178_s10, 128 }
 0x1ca   : > { %p839_p11 = scmp.ne.s32.totalorder %s1178_s10, %s838_s29  ;;  %s971_s0 = smov [#allocation7]  }
 0x1cb   : > { %s842_s8 = sshll.u32 %s971_s0, 4  ;;  %s843_s8 = int_to_ptr.vmem [resolvable:$false] %s842_s8 }
 0x1cc   : > { %p840_p0 = pnand %p839_p11, %p1097_p10  ;;  %s844_s9 = scalar_lea.vmem %s843_s8, 256 }
 0x1cd   : > { %p845_p9 = scmp.lt.s32.totalorder %s1178_s10, %s843_s8  ;;  %p846_p1 = scmp.lt.s32.totalorder %s844_s9, %s838_s29 }
 0x1ce   : > { %p841_p5 = pneg %p840_p0 }
 0x1cf   : > { %p847_p2 = por %p846_p1, %p845_p9 }
 0x1d1   : > { %p848_p7 = pnand %p847_p2, %p841_p5 }
 0x1d3   : > { %851 = shalt.err (!%p848_p7)
}
 0x1d4   : > { %s852_s15 = scalar_lea.hbm %s1188_s12, 128  ;;  %s856_s16 = scalar_lea.hbm %s1308_s3, 256 }
 0x1d5   : > { %p853_p3 = scmp.ne.s32.totalorder %s1188_s12, %s852_s15  ;;  %p857_p6 = scmp.lt.u32.totalorder %s1188_s12, %s1308_s3 }
 0x1d6   : > { %p858_p8 = scmp.lt.u32.totalorder %s856_s16, %s852_s15  ;;  %p860_p11 = scmp.lt.u32.totalorder %s852_s15, %s1188_s12 }
 0x1d7   : > { %p854_p4 = pnand %p853_p3, %p1097_p10 }
 0x1d8   : > { %p859_p12 = por %p858_p8, %p857_p6 }
 0x1d9   : > { %p855_p13 = pneg %p854_p4 }
 0x1da   : > { %p861_p0 = por %p860_p11, %p859_p12 }
 0x1dc   : > { %p862_p5 = pnand %p861_p0, %p855_p13 }
 0x1de   : > { %865 = shalt.err (!%p862_p5)
}
 0x1df   : > { %663 = dma.vmem_to_hbm [thread:$0]  (%p1097_p10), %s1178_s10, 128, %s1188_s12, %s393_s17, %s1335_s2, %s1335_s2, %s970_s1   ;;  %v388_v15 = vpop.permute.xlu0 %387 }
 0x1e0   : > { %630 = vst.msk [vmem:[%s1170_s28 + $0x4] sm:$0xf] %vm364_vm2, %v388_v15  ;;  %s866_s29 = scalar_lea.vmem %s1190_s6, 128  ;;  %s972_s8 = smov [#allocation10]  }
 0x1e1   : > { %p867_p9 = scmp.ne.s32.totalorder %s1190_s6, %s866_s29  ;;  %s870_s9 = sshll.u32 %s972_s8, 4  ;;  %s871_s9 = int_to_ptr.vmem [resolvable:$false] %s870_s9 }
 0x1e2   : > { %s872_s25 = scalar_lea.vmem %s871_s9, 256  ;;  %p873_p7 = scmp.lt.s32.totalorder %s1190_s6, %s871_s9 }
 0x1e3   : > { %p868_p1 = pnand %p867_p9, %p1097_p10  ;;  %p874_p3 = scmp.lt.s32.totalorder %s872_s25, %s866_s29 }
 0x1e5   : > { %p869_p2 = pneg %p868_p1  ;;  %p875_p4 = por %p874_p3, %p873_p7 }
 0x1e7   : > { %p876_p13 = pnand %p875_p4, %p869_p2 }
 0x1e9   : > { %879 = shalt.err (!%p876_p13)
}
 0x1ea   : > { %s880_s10 = scalar_lea.hbm %s1197_s24, 128  ;;  %s884_s17 = scalar_lea.hbm %s1310_s5, 256 }
 0x1eb   : > { %p881_p6 = scmp.ne.s32.totalorder %s1197_s24, %s880_s10  ;;  %p885_p11 = scmp.lt.u32.totalorder %s1197_s24, %s1310_s5 }
 0x1ec   : > { %p886_p0 = scmp.lt.u32.totalorder %s884_s17, %s880_s10  ;;  %p888_p9 = scmp.lt.u32.totalorder %s880_s10, %s1197_s24 }
 0x1ed   : > { %p882_p8 = pnand %p881_p6, %p1097_p10 }
 0x1ee   : > { %p887_p5 = por %p886_p0, %p885_p11 }
 0x1ef   : > { %p883_p12 = pneg %p882_p8 }
 0x1f0   : > { %p889_p1 = por %p888_p9, %p887_p5 }
 0x1f2   : > { %p890_p2 = pnand %p889_p1, %p883_p12 }
 0x1f4   : > { %893 = shalt.err (!%p890_p2)
}
 0x1f5   : > { %665 = dma.vmem_to_hbm [thread:$0]  (%p1097_p10), %s1190_s6, 128, %s1197_s24, %s1199_s30, %s1335_s2, %s1335_s2, %s970_s1  }
 0x1f6 PF: > { %s466_s14 = sand.u32 1, %s936_s18   ;;  %p1336_p7 = scmp.ne.s32.totalorder %s1321_s27, 0 }
 0x1f7   : > { %p1337_p3 = scmp.ge.s32.totalorder %s956_s23, 2  ;;  %s467_s16 = scalar_lea.sflag [#allocation4], %s466_s14 }
 0x1f9   : > { %p678_p4 = pnand %p1337_p3, %p1336_p7 }
 0x1fb   : > { %927 = dma.done.wait (!%p678_p4), %s467_s16, 128  }
 0x1fc   : > { %929 = vsyncadd (!%p678_p4), %s467_s16, 4294967168  ;;  %s1338_s11 = sadd.s32 4294967294, %s956_s23  }
 0x1fd   : > { %s475_s26 = sand.u32 1, %s1338_s11  }
 0x1fe   : > { %s476_s0 = scalar_lea.sflag [#allocation9], %s475_s26 }
 0x1ff   : > { %931 = dma.done.wait (!%p678_p4), %s476_s0, 256  }
 0x200   : > { %933 = vsyncadd (!%p678_p4), %s476_s0, 4294967040  ;;  %s26_s23 = sadd.s32 1, %s956_s23   ;;  %s1339_s18 = smov %s940_s19 }
 0x201   : > { %p23_p10 = scmp.ge.s32.totalorder %s26_s23, 4   ;;  %s1340_s19 = smov %s944_s20 }
 0x202   : > { %s1341_s20 = smov %s1106_s13  ;;  %s1342_s21 = smov %s952_s22 }
 0x203   : > { %s1343_s22 = smov %s1345_s7  ;;  %25 = sbr.rel (!%p23_p10) target bundleno = 13 (0xd), region = 116 }
 0x20a   :  { %490 = vsyncpa [#allocation3], 1 }
 0x20b   :  { %492 = vsyncpa [#allocation3 + $0x1], 1 }
 0x20c   :  { %493 = vsyncpa [#allocation6], 1 }
 0x20d   :  { %494 = vsyncpa [#allocation4], 1 }
 0x20e   :  { %496 = vsyncpa [#allocation4 + $0x1], 1 }
 0x20f   :  { %497 = vsyncpa [#allocation9], 1 }
 0x210   :  { %499 = vsyncpa [#allocation9 + $0x1], 1 }

</bundles_post_ra>
